<compile_context>
chip_gen: v6e
topology: v6e:2x2x1
jax: 0.10.0
libtpu: 0.0.40
codegen_flags: <defaults>
</compile_context>

<pallas_src>
import jax
import jax.numpy as jnp
from jax import lax
from jax.experimental import pallas as pl
from jax.experimental.pallas import tpu as pltpu


def tokenizer_kernel(idx_ref, table_ref, w_ref, b_ref, out_ref, pooled_ref):
    phase = pl.program_id(0)      # 0: pooled-embedding reduction, 1: logits emit
    i = pl.program_id(1)          # vocab tile index within the phase
    n_i = pl.num_programs(1)

    B_pad, S = idx_ref.shape
    tv = table_ref.shape[0]

    @pl.when(phase == 0)
    def _pool():
        @pl.when(i == 0)
        def _init():
            pooled_ref[...] = jnp.zeros_like(pooled_ref)

        # Bag-of-words counts for the vocab ids covered by this table tile.
        vocab_ids = i * tv + lax.broadcasted_iota(jnp.int32, (B_pad, tv), 1)
        counts = jnp.zeros((B_pad, tv), jnp.float32)
        for s in range(S):  # S is small — unrolled VPU compare/add, no reshapes
            counts = counts + (idx_ref[:, pl.ds(s, 1)] == vocab_ids).astype(jnp.float32)

        # gather + sum-over-seq fused into one MXU matmul
        pooled_ref[...] += jnp.dot(counts, table_ref[...],
                                   preferred_element_type=jnp.float32)

        @pl.when(i == n_i - 1)
        def _finalize_mean():
            pooled_ref[...] = pooled_ref[...] * jnp.float32(1.0 / S)

    @pl.when(phase == 1)
    def _logits():
        out_ref[...] = (jnp.dot(pooled_ref[...], w_ref[...],
                                preferred_element_type=jnp.float32)
                        + b_ref[...])


def simple_tokenizer(idx, table, w_t, b, *, tv=None):
    """idx: (B, S) int32; table: (V, E) f32; w_t: (E, V) f32; b: (V,) f32 -> (B, V) f32."""
    B, S = idx.shape
    V, E = table.shape

    # Vocab tile: full vocab if small (single tile, lane-dense), else stream 512-wide tiles.
    if tv is None:
        tv = V if V <= 512 else 512
    assert V % tv == 0 and (tv == V or tv % 128 == 0), "vocab tile must divide V and be lane-aligned"
    n_v = V // tv

    # Pad batch to a full sublane group so the MXU M-dim is not tiny (rows sliced off below).
    B_pad = ((B + 7) // 8) * 8
    idx_p = jnp.pad(idx, ((0, B_pad - B), (0, 0)))  # pad ids = 0 (valid rows, discarded)

    out = pl.pallas_call(
        tokenizer_kernel,
        out_shape=jax.ShapeDtypeStruct((B_pad, V), jnp.float32),
        grid_spec=pltpu.PrefetchScalarGridSpec(
            num_scalar_prefetch=0,
            grid=(2, n_v),  # (phase, vocab tile) — phase 0 fully precedes phase 1
            in_specs=[
                # token ids: one small block, loaded once
                pl.BlockSpec((B_pad, S), lambda p, i: (0, 0)),
                # embedding table: streamed in phase 0; pinned to its last tile in
                # phase 1 so no redundant DMA is issued.
                pl.BlockSpec((tv, E), lambda p, i: (jnp.where(p == 0, i, n_v - 1), 0)),
                # fc weight (stored transposed): pinned to tile 0 during phase 0
                # (acts as prefetch), streamed across output tiles in phase 1.
                pl.BlockSpec((E, tv), lambda p, i: (0, jnp.where(p == 0, 0, i))),
                # fc bias: matching output tiles
                pl.BlockSpec((1, tv), lambda p, i: (0, jnp.where(p == 0, 0, i))),
            ],
            # logits output: lane-dense (tv >= 128) tiles, each written exactly once
            out_specs=pl.BlockSpec((B_pad, tv), lambda p, i: (0, jnp.where(p == 0, 0, i))),
            scratch_shapes=[pltpu.VMEM((B_pad, E), jnp.float32)],  # pooled accumulator
        ),
        compiler_params=pltpu.CompilerParams(
            dimension_semantics=("arbitrary", "arbitrary"),
            vmem_limit_bytes=32 * 1024 * 1024,
        ),
    )(idx_p, table, w_t, b.reshape(1, V))
    return out[:B]


if __name__ == "__main__":
    vocab_size = 256
    embedding_dim = 64
    batch = 2
    seq = 8

    key = jax.random.PRNGKey(0)
    k_idx, k_emb, k_w, k_b = jax.random.split(key, 4)

    # Deterministic synthetic parameters (shapes per module __init__).
    table = jax.random.normal(k_emb, (vocab_size, embedding_dim), jnp.float32)
    # nn.Linear(embedding_dim, vocab_size): weight (vocab, embed) — stored transposed.
    w_t = jax.random.normal(k_w, (embedding_dim, vocab_size), jnp.float32) * 0.05
    b = jax.random.normal(k_b, (vocab_size,), jnp.float32) * 0.05

    idx = jax.random.randint(k_idx, (batch, seq), 0, vocab_size, jnp.int32)

    out = jax.block_until_ready(simple_tokenizer(idx, table, w_t, b))

    # Pure-JAX reference (embedding -> mean(dim=1) -> linear).
    ref = jnp.take(table, idx, axis=0).mean(axis=1) @ w_t + b
    assert out.shape == (batch, vocab_size)
    assert jnp.allclose(out, ref, atol=1e-4, rtol=1e-4)

    print("KERNEL_OK")
</pallas_src>

<mosaic_0001>
module attributes {stable_mosaic.version = 11 : i64} {
  func.func @tokenizer_kernel(%arg0: i32, %arg1: i32, %arg2: memref<8x8xi32, #tpu.memory_space<vmem>>, %arg3: memref<256x64xf32, #tpu.memory_space<vmem>>, %arg4: memref<64x256xf32, #tpu.memory_space<vmem>>, %arg5: memref<1x256xf32, #tpu.memory_space<vmem>>, %arg6: memref<8x256xf32, #tpu.memory_space<vmem>>, %arg7: memref<8x64xf32, #tpu.memory_space<vmem>>) attributes {dimension_semantics = [#tpu.dimension_semantics<arbitrary>, #tpu.dimension_semantics<arbitrary>], iteration_bounds = array<i64: 2, 1>, scalar_prefetch = 0 : i64, scratch_operands = 1 : i64, tpu.core_type = #tpu.core_type<tc>, window_params = [{pipeline_mode = #tpu.pipeline_mode<synchronous>, transform_indices = @transform_0, window_bounds = array<i64: 8, 8>}, {transform_indices = @transform_1, window_bounds = array<i64: 256, 64>}, {transform_indices = @transform_2, window_bounds = array<i64: 64, 256>}, {transform_indices = @transform_3, window_bounds = array<i64: 1, 256>}, {transform_indices = @transform_4, window_bounds = array<i64: 8, 256>}]} {
    %c0_i32 = arith.constant 0 : i32
    %0 = arith.cmpi eq, %arg0, %c0_i32 : i32
    %1 = arith.extui %0 : i1 to i32
    %c0_i32_0 = arith.constant 0 : i32
    %2 = arith.cmpi ne, %1, %c0_i32_0 : i32
    scf.if %2 {
      %c0_i32_2 = arith.constant 0 : i32
      %6 = arith.cmpi eq, %arg1, %c0_i32_2 : i32
      %7 = arith.extui %6 : i1 to i32
      %c0_i32_3 = arith.constant 0 : i32
      %8 = arith.cmpi ne, %7, %c0_i32_3 : i32
      scf.if %8 {
        %cst_21 = arith.constant 0.000000e+00 : f32
        %70 = vector.broadcast %cst_21 : f32 to vector<8x64xf32>
        %c0_22 = arith.constant 0 : index
        %c0_23 = arith.constant 0 : index
        %71 = vector.load %arg7[%c0_22, %c0_23] : memref<8x64xf32, #tpu.memory_space<vmem>>, vector<8x64xf32>
        tpu.vector_store %arg7[%c0_22, %c0_23], %70 {strides = array<i32>} : memref<8x64xf32, #tpu.memory_space<vmem>>, vector<8x64xf32>,
      } else {
      }
      %c256_i32 = arith.constant 256 : i32
      %9 = arith.muli %arg1, %c256_i32 : i32
      %10 = tpu.iota {dimensions = array<i32: 1>} : vector<8x256xi32>
      %11 = vector.broadcast %9 : i32 to vector<8x256xi32>
      %12 = arith.addi %11, %10 : vector<8x256xi32>
      %cst = arith.constant 0.000000e+00 : f32
      %13 = vector.broadcast %cst : f32 to vector<8x256xf32>
      %c0 = arith.constant 0 : index
      %c0_4 = arith.constant 0 : index
      %14 = vector.load %arg2[%c0, %c0_4] : memref<8x8xi32, #tpu.memory_space<vmem>>, vector<8x1xi32>
      %15 = vector.broadcast %14 : vector<8x1xi32> to vector<8x256xi32>
      %16 = arith.cmpi eq, %15, %12 : vector<8x256xi32>
      %17 = arith.extui %16 : vector<8x256xi1> to vector<8x256xi32>
      %18 = arith.sitofp %17 : vector<8x256xi32> to vector<8x256xf32>
      %19 = arith.addf %13, %18 : vector<8x256xf32>
      %c0_5 = arith.constant 0 : index
      %c1 = arith.constant 1 : index
      %20 = vector.load %arg2[%c0_5, %c1] : memref<8x8xi32, #tpu.memory_space<vmem>>, vector<8x1xi32>
      %21 = vector.broadcast %20 : vector<8x1xi32> to vector<8x256xi32>
      %22 = arith.cmpi eq, %21, %12 : vector<8x256xi32>
      %23 = arith.extui %22 : vector<8x256xi1> to vector<8x256xi32>
      %24 = arith.sitofp %23 : vector<8x256xi32> to vector<8x256xf32>
      %25 = arith.addf %19, %24 : vector<8x256xf32>
      %c0_6 = arith.constant 0 : index
      %c2 = arith.constant 2 : index
      %26 = vector.load %arg2[%c0_6, %c2] : memref<8x8xi32, #tpu.memory_space<vmem>>, vector<8x1xi32>
      %27 = vector.broadcast %26 : vector<8x1xi32> to vector<8x256xi32>
      %28 = arith.cmpi eq, %27, %12 : vector<8x256xi32>
      %29 = arith.extui %28 : vector<8x256xi1> to vector<8x256xi32>
      %30 = arith.sitofp %29 : vector<8x256xi32> to vector<8x256xf32>
      %31 = arith.addf %25, %30 : vector<8x256xf32>
      %c0_7 = arith.constant 0 : index
      %c3 = arith.constant 3 : index
      %32 = vector.load %arg2[%c0_7, %c3] : memref<8x8xi32, #tpu.memory_space<vmem>>, vector<8x1xi32>
      %33 = vector.broadcast %32 : vector<8x1xi32> to vector<8x256xi32>
      %34 = arith.cmpi eq, %33, %12 : vector<8x256xi32>
      %35 = arith.extui %34 : vector<8x256xi1> to vector<8x256xi32>
      %36 = arith.sitofp %35 : vector<8x256xi32> to vector<8x256xf32>
      %37 = arith.addf %31, %36 : vector<8x256xf32>
      %c0_8 = arith.constant 0 : index
      %c4 = arith.constant 4 : index
      %38 = vector.load %arg2[%c0_8, %c4] : memref<8x8xi32, #tpu.memory_space<vmem>>, vector<8x1xi32>
      %39 = vector.broadcast %38 : vector<8x1xi32> to vector<8x256xi32>
      %40 = arith.cmpi eq, %39, %12 : vector<8x256xi32>
      %41 = arith.extui %40 : vector<8x256xi1> to vector<8x256xi32>
      %42 = arith.sitofp %41 : vector<8x256xi32> to vector<8x256xf32>
      %43 = arith.addf %37, %42 : vector<8x256xf32>
      %c0_9 = arith.constant 0 : index
      %c5 = arith.constant 5 : index
      %44 = vector.load %arg2[%c0_9, %c5] : memref<8x8xi32, #tpu.memory_space<vmem>>, vector<8x1xi32>
      %45 = vector.broadcast %44 : vector<8x1xi32> to vector<8x256xi32>
      %46 = arith.cmpi eq, %45, %12 : vector<8x256xi32>
      %47 = arith.extui %46 : vector<8x256xi1> to vector<8x256xi32>
      %48 = arith.sitofp %47 : vector<8x256xi32> to vector<8x256xf32>
      %49 = arith.addf %43, %48 : vector<8x256xf32>
      %c0_10 = arith.constant 0 : index
      %c6 = arith.constant 6 : index
      %50 = vector.load %arg2[%c0_10, %c6] : memref<8x8xi32, #tpu.memory_space<vmem>>, vector<8x1xi32>
      %51 = vector.broadcast %50 : vector<8x1xi32> to vector<8x256xi32>
      %52 = arith.cmpi eq, %51, %12 : vector<8x256xi32>
      %53 = arith.extui %52 : vector<8x256xi1> to vector<8x256xi32>
      %54 = arith.sitofp %53 : vector<8x256xi32> to vector<8x256xf32>
      %55 = arith.addf %49, %54 : vector<8x256xf32>
      %c0_11 = arith.constant 0 : index
      %c7 = arith.constant 7 : index
      %56 = vector.load %arg2[%c0_11, %c7] : memref<8x8xi32, #tpu.memory_space<vmem>>, vector<8x1xi32>
      %57 = vector.broadcast %56 : vector<8x1xi32> to vector<8x256xi32>
      %58 = arith.cmpi eq, %57, %12 : vector<8x256xi32>
      %59 = arith.extui %58 : vector<8x256xi1> to vector<8x256xi32>
      %60 = arith.sitofp %59 : vector<8x256xi32> to vector<8x256xf32>
      %61 = arith.addf %55, %60 : vector<8x256xf32>
      %c0_12 = arith.constant 0 : index
      %c0_13 = arith.constant 0 : index
      %62 = vector.load %arg7[%c0_12, %c0_13] : memref<8x64xf32, #tpu.memory_space<vmem>>, vector<8x64xf32>
      %c0_14 = arith.constant 0 : index
      %c0_15 = arith.constant 0 : index
      %63 = vector.load %arg3[%c0_14, %c0_15] : memref<256x64xf32, #tpu.memory_space<vmem>>, vector<256x64xf32>
      %cst_16 = arith.constant dense<0.000000e+00> : vector<8x64xf32>
      %64 = tpu.matmul %61, %63, %cst_16 {dimension_numbers = #tpu.dot_dimension_numbers<[1], [0], [0], [1], [0, 0, 1, 1], [], []>} : vector<8x256xf32>, vector<256x64xf32>, vector<8x64xf32> -> vector<8x64xf32>
      %65 = arith.addf %62, %64 : vector<8x64xf32>
      %c0_17 = arith.constant 0 : index
      %c0_18 = arith.constant 0 : index
      %66 = vector.load %arg7[%c0_17, %c0_18] : memref<8x64xf32, #tpu.memory_space<vmem>>, vector<8x64xf32>
      tpu.vector_store %arg7[%c0_17, %c0_18], %65 {strides = array<i32>} : memref<8x64xf32, #tpu.memory_space<vmem>>, vector<8x64xf32>,
      %c0_i32_19 = arith.constant 0 : i32
      %67 = arith.cmpi eq, %arg1, %c0_i32_19 : i32
      %68 = arith.extui %67 : i1 to i32
      %c0_i32_20 = arith.constant 0 : i32
      %69 = arith.cmpi ne, %68, %c0_i32_20 : i32
      scf.if %69 {
        %c0_21 = arith.constant 0 : index
        %c0_22 = arith.constant 0 : index
        %70 = vector.load %arg7[%c0_21, %c0_22] : memref<8x64xf32, #tpu.memory_space<vmem>>, vector<8x64xf32>
        %cst_23 = arith.constant 1.250000e-01 : f32
        %71 = vector.broadcast %cst_23 : f32 to vector<8x64xf32>
        %72 = arith.mulf %70, %71 : vector<8x64xf32>
        %c0_24 = arith.constant 0 : index
        %c0_25 = arith.constant 0 : index
        %73 = vector.load %arg7[%c0_24, %c0_25] : memref<8x64xf32, #tpu.memory_space<vmem>>, vector<8x64xf32>
        tpu.vector_store %arg7[%c0_24, %c0_25], %72 {strides = array<i32>} : memref<8x64xf32, #tpu.memory_space<vmem>>, vector<8x64xf32>,
      } else {
      }
    } else {
    }
    %c1_i32 = arith.constant 1 : i32
    %3 = arith.cmpi eq, %arg0, %c1_i32 : i32
    %4 = arith.extui %3 : i1 to i32
    %c0_i32_1 = arith.constant 0 : i32
    %5 = arith.cmpi ne, %4, %c0_i32_1 : i32
    scf.if %5 {
      %c0 = arith.constant 0 : index
      %c0_2 = arith.constant 0 : index
      %6 = vector.load %arg7[%c0, %c0_2] : memref<8x64xf32, #tpu.memory_space<vmem>>, vector<8x64xf32>
      %c0_3 = arith.constant 0 : index
      %c0_4 = arith.constant 0 : index
      %7 = vector.load %arg4[%c0_3, %c0_4] : memref<64x256xf32, #tpu.memory_space<vmem>>, vector<64x256xf32>
      %cst = arith.constant dense<0.000000e+00> : vector<8x256xf32>
      %8 = tpu.matmul %6, %7, %cst {dimension_numbers = #tpu.dot_dimension_numbers<[1], [0], [0], [1], [0, 0, 1, 1], [], []>} : vector<8x64xf32>, vector<64x256xf32>, vector<8x256xf32> -> vector<8x256xf32>
      %c0_5 = arith.constant 0 : index
      %c0_6 = arith.constant 0 : index
      %9 = vector.load %arg5[%c0_5, %c0_6] : memref<1x256xf32, #tpu.memory_space<vmem>>, vector<1x256xf32>
      %10 = vector.broadcast %9 : vector<1x256xf32> to vector<8x256xf32>
      %11 = arith.addf %8, %10 : vector<8x256xf32>
      %c0_7 = arith.constant 0 : index
      %c0_8 = arith.constant 0 : index
      %12 = vector.load %arg6[%c0_7, %c0_8] : memref<8x256xf32, #tpu.memory_space<vmem>>, vector<8x256xf32>
      tpu.vector_store %arg6[%c0_7, %c0_8], %11 {strides = array<i32>} : memref<8x256xf32, #tpu.memory_space<vmem>>, vector<8x256xf32>,
    } else {
    }
    return
  }
  func.func @transform_0(%arg0: i32, %arg1: i32) -> (i32, i32) {
    %c0_i32 = arith.constant 0 : i32
    %c0_i32_0 = arith.constant 0 : i32
    %c0_i32_1 = arith.constant 0 : i32
    return %c0_i32, %c0_i32_0 : i32, i32
  }
  func.func @transform_1(%arg0: i32, %arg1: i32) -> (i32, i32) {
    %c0_i32 = arith.constant 0 : i32
    %0 = arith.cmpi eq, %arg0, %c0_i32 : i32
    %c0_i32_0 = arith.constant 0 : i32
    %1 = arith.select %0, %arg1, %c0_i32_0 : i32
    %c0_i32_1 = arith.constant 0 : i32
    %c0_i32_2 = arith.constant 0 : i32
    return %1, %c0_i32_1 : i32, i32
  }
  func.func @transform_2(%arg0: i32, %arg1: i32) -> (i32, i32) {
    %c0_i32 = arith.constant 0 : i32
    %0 = arith.cmpi eq, %arg0, %c0_i32 : i32
    %c0_i32_0 = arith.constant 0 : i32
    %1 = arith.select %0, %c0_i32_0, %arg1 : i32
    %c0_i32_1 = arith.constant 0 : i32
    %c0_i32_2 = arith.constant 0 : i32
    return %c0_i32_1, %1 : i32, i32
  }
  func.func @transform_3(%arg0: i32, %arg1: i32) -> (i32, i32) {
    %c0_i32 = arith.constant 0 : i32
    %0 = arith.cmpi eq, %arg0, %c0_i32 : i32
    %c0_i32_0 = arith.constant 0 : i32
    %1 = arith.select %0, %c0_i32_0, %arg1 : i32
    %c0_i32_1 = arith.constant 0 : i32
    %c0_i32_2 = arith.constant 0 : i32
    return %c0_i32_1, %1 : i32, i32
  }
  func.func @transform_4(%arg0: i32, %arg1: i32) -> (i32, i32) {
    %c0_i32 = arith.constant 0 : i32
    %0 = arith.cmpi eq, %arg0, %c0_i32 : i32
    %c0_i32_0 = arith.constant 0 : i32
    %1 = arith.select %0, %c0_i32_0, %arg1 : i32
    %c0_i32_1 = arith.constant 0 : i32
    %c0_i32_2 = arith.constant 0 : i32
    return %c0_i32_1, %1 : i32, i32
  }
}

</mosaic_0001>

<bundles_post_ra>
// kernel: tpu_custom_call.1
= control target key start
LH: loop header
LB: loop body
LE: loop exit
PB: predicated region body
PF: predicated region fallthrough
CT: control target
= control target key end

     0   :  { %9 = vsyncpa [#allocation4], 0  ;;  %s1141_s0 = inlined_call_operand.vmem [shape: s32[8,8], index: 0, kind: input, shape index: {}]   ;;  %s1142_s1 = inlined_call_operand.vmem [shape: f32[256,64], index: 1, kind: input, shape index: {}]   ;;  %s1143_s2 = inlined_call_operand.vmem [shape: f32[64,256], index: 2, kind: input, shape index: {}]   ;;  %s1144_s3 = inlined_call_operand.vmem [shape: f32[1,256], index: 3, kind: input, shape index: {}]   ;;  %s1145_s4 = inlined_call_operand.hbm [shape: f32[8,256], index: 4, kind: output, shape index: {}]  }
   0x1   :  { %11 = vsyncpa [#allocation4 + $0x1], 0  ;;  %s942_s15 = smov 0   ;;  %s944_s16 = smov 0  }
   0x2   :  { %s946_s17 = smov 0  }
   0x3 LB: > { %s733_s18 = sadd.s32 4294967295, %s904_s17   ;;  %s734_s19 = sadd.s32 4294967294, %s904_s17   ;;  %s904_s17 = sphi %s946_s17, %s17_s17   ;;  %s900_s16 = sphi %s944_s16, %s1148_s16   ;;  %s896_s15 = sphi %s942_s15, %s1147_s15  }
   0x4   : > { %s29_s20 = sadd.s32 1, %s900_s16  ;;  %p740_p0 = scmp.ge.s32.totalorder %s904_s17, 1 }
   0x5   : > { %p31_p1 = scmp.ge.s32.totalorder %s29_s20, 2  ;;  %p227_p2 = scmp.lt.s32.totalorder %s904_s17, 3 }
   0x7   : > { %s1150_s20 = smov (%p31_p1, %s29_s20), 0  ;;  %p228_p3 = pnand %p740_p0, %p227_p2 }
   0x8   : > { %p741_p4 = scmp.ne.s32.totalorder (!%p228_p3), %s896_s15, 0 }
   0x9   : > { %231 = sbr.rel (%p228_p3) target bundleno = 615 (0x267), region = 36 }
   0xe   : > { %303 = sbr.rel (%p741_p4) target bundleno = 380 (0x17c), region = 40 }
  0x13   : > { %v317_v0 = vld [vmem:[%s1141_s0] sm:$0xff]  ;;  %v438_v1 = vld [vmem:[%s1142_s1 + $0xf8] sm:$0xff]  ;;  %v906_v2 = vmov 2   ;;  %v907_v3 = vmov 0   ;;  %v437_v5 = vld [vmem:[%s1142_s1 + $0xf0] sm:$0xff]  ;;  %v908_v7 = vmov 3   ;;  %v311_v41 = vlaneseq }
  0x14   : > { %847 = vset.pattern.permute.xlu1 %v906_v2  ;;  %845 = vset.pattern.permute.xlu0 %v907_v3  ;;  %v422_v4 = vld [vmem:[%s1142_s1 + $0x78] sm:$0xff]  ;;  %v421_v6 = vld [vmem:[%s1142_s1 + $0x70] sm:$0xff]  ;;  %v909_v8 = vmov 1   ;;  %v436_v9 = vld [vmem:[%s1142_s1 + $0xe8] sm:$0xff]  ;;  %v910_v12 = vmov 4   ;;  %v911_v13 = vmov 5  }
  0x15   : > { %341 = vperm.xlu1 %847, %v317_v0   ;;  %319 = vperm.xlu0 %845, %v317_v0   ;;  %v420_v10 = vld [vmem:[%s1142_s1 + $0x68] sm:$0xff]  ;;  %v435_v11 = vld [vmem:[%s1142_s1 + $0xe0] sm:$0xff]  ;;  %v434_v15 = vld [vmem:[%s1142_s1 + $0xd8] sm:$0xff]  ;;  %v912_v19 = vmov 6   ;;  %v913_v23 = vmov 7   ;;  %v312_v42 = vand.u32 127, %v311_v41 }
  0x16   : > { %764 = vmatprep.subr.mxu0 %v438_v1  ;;  %v419_v14 = vld [vmem:[%s1142_s1 + $0x60] sm:$0xff]  ;;  %v418_v16 = vld [vmem:[%s1142_s1 + $0x58] sm:$0xff]  ;;  %v433_v17 = vld [vmem:[%s1142_s1 + $0xd0] sm:$0xff]  ;;  %v914_v48 = vmov 0.0  }
  0x17   : > { %765 = vmatpush3.msra.mxu0 %v422_v4  ;;  %v417_v18 = vld [vmem:[%s1142_s1 + $0x50] sm:$0xff]  ;;  %v432_v20 = vld [vmem:[%s1142_s1 + $0xc8] sm:$0xff]  ;;  %v431_v22 = vld [vmem:[%s1142_s1 + $0xc0] sm:$0xff]  ;;  %v313_v45 = vadd.s32 128, %v312_v42 }
  0x18   : > { %766 = vmatprep.subr.mxu0 %v437_v5  ;;  %v416_v21 = vld [vmem:[%s1142_s1 + $0x48] sm:$0xff]  ;;  %v415_v24 = vld [vmem:[%s1142_s1 + $0x40] sm:$0xff]  ;;  %v430_v25 = vld [vmem:[%s1142_s1 + $0xb8] sm:$0xff] }
  0x19   : > { %848 = vset.pattern.permute.xlu1 %v908_v7  ;;  %846 = vset.pattern.permute.xlu0 %v909_v8  ;;  %v414_v26 = vld [vmem:[%s1142_s1 + $0x38] sm:$0xff]  ;;  %v429_v27 = vld [vmem:[%s1142_s1 + $0xb0] sm:$0xff]  ;;  %v428_v29 = vld [vmem:[%s1142_s1 + $0xa8] sm:$0xff] }
  0x1a   : > { %352 = vperm.xlu1 %848, %v317_v0   ;;  %330 = vperm.xlu0 %846, %v317_v0   ;;  %v413_v28 = vld [vmem:[%s1142_s1 + $0x30] sm:$0xff]  ;;  %v412_v30 = vld [vmem:[%s1142_s1 + $0x28] sm:$0xff]  ;;  %v427_v31 = vld [vmem:[%s1142_s1 + $0xa0] sm:$0xff] }
  0x1b   : > { %767 = vmatpush3.msra.mxu0 %v421_v6  ;;  %v411_v32 = vld [vmem:[%s1142_s1 + $0x20] sm:$0xff]  ;;  %v426_v33 = vld [vmem:[%s1142_s1 + $0x98] sm:$0xff]  ;;  %v425_v35 = vld [vmem:[%s1142_s1 + $0x90] sm:$0xff] }
  0x1c   : > { %768 = vmatprep.subr.mxu0 %v436_v9  ;;  %v410_v34 = vld [vmem:[%s1142_s1 + $0x18] sm:$0xff]  ;;  %v409_v36 = vld [vmem:[%s1142_s1 + $0x10] sm:$0xff]  ;;  %v424_v37 = vld [vmem:[%s1142_s1 + $0x88] sm:$0xff] }
  0x1d   : > { %769 = vmatpush3.msra.mxu0 %v420_v10  ;;  %v408_v38 = vld [vmem:[%s1142_s1 + $0x8] sm:$0xff]  ;;  %v423_v39 = vld [vmem:[%s1142_s1 + $0x80] sm:$0xff] }
  0x1e   : > { %849 = vset.pattern.permute.xlu1 %v910_v12  ;;  %850 = vset.pattern.permute.xlu0 %v911_v13  ;;  %v407_v40 = vld [vmem:[%s1142_s1] sm:$0xff] }
  0x1f   : > { %363 = vperm.xlu1 %849, %v317_v0   ;;  %374 = vperm.xlu0 %850, %v317_v0  }
  0x20   : > { %770 = vmatprep.subr.mxu0 %v435_v11 }
  0x21   : > { %771 = vmatpush3.msra.mxu0 %v419_v14 }
  0x22   : > { %772 = vmatprep.subr.mxu0 %v434_v15 }
  0x23   : > { %851 = vset.pattern.permute.xlu1 %v912_v19  ;;  %773 = vmatpush3.msra.mxu0 %v418_v16 }
  0x24   : > { %385 = vperm.xlu1 %851, %v317_v0   ;;  %774 = vmatprep.subr.mxu0 %v433_v17 }
  0x25   : > { %775 = vmatpush3.msra.mxu0 %v417_v18  ;;  %853 = vset.pattern.permute.xlu0 %v913_v23 }
  0x26   : > { %776 = vmatprep.subr.mxu0 %v432_v20 }
  0x27   : > { %777 = vmatpush3.msra.mxu0 %v416_v21 }
  0x28   : > { %852 = vset.pattern.permute.xlu1 %v913_v23  ;;  %778 = vmatprep.subr.mxu0 %v431_v22 }
  0x29   : > { %396 = vperm.xlu1 %852, %v317_v0   ;;  %779 = vmatpush3.msra.mxu0 %v415_v24 }
  0x2a   : > { %780 = vmatprep.subr.mxu0 %v430_v25 }
  0x2b   : > { %781 = vmatpush3.msra.mxu0 %v414_v26 }
  0x2c   : > { %782 = vmatprep.subr.mxu0 %v429_v27 }
  0x2d   : > { %783 = vmatpush3.msra.mxu0 %v413_v28 }
  0x2e   : > { %784 = vmatprep.subr.mxu0 %v428_v29 }
  0x2f   : > { %785 = vmatpush3.msra.mxu0 %v412_v30 }
  0x30   : > { %786 = vmatprep.subr.mxu0 %v427_v31 }
  0x31   : > { %787 = vmatpush3.msra.mxu0 %v411_v32 }
  0x32   : > { %788 = vmatprep.subr.mxu0 %v426_v33 }
  0x33   : > { %789 = vmatpush3.msra.mxu0 %v410_v34 }
  0x34   : > { %790 = vmatprep.subr.mxu0 %v425_v35 }
  0x35   : > { %791 = vmatpush3.msra.mxu0 %v409_v36 }
  0x36   : > { %792 = vmatprep.subr.mxu0 %v424_v37 }
  0x37   : > { %793 = vmatpush3.msra.mxu0 %v408_v38 }
  0x38   : > { %794 = vmatprep.subr.mxu0 %v423_v39 }
  0x39   : > { %795 = vmatpush3.msra.mxu0 %v407_v40 }
  0x90   : > { %v342_v43 = vpop.permute.xlu1 %341  ;;  %v320_v44 = vpop.permute.xlu0 %319 }
  0x91   : > { %vm321_vm0 = vcmp.eq.s32.totalorder %v320_v44, %v312_v42  ;;  %vm322_vm1 = vcmp.eq.s32.totalorder %v320_v44, %v313_v45  ;;  %vm343_vm2 = vcmp.eq.s32.totalorder %v342_v43, %v312_v42  ;;  %vm344_vm3 = vcmp.eq.s32.totalorder %v342_v43, %v313_v45 }
  0x92   : > { %v742_v49 = vsel %vm321_vm0, 1.0, %v914_v48  ;;  %v743_v50 = vsel %vm322_vm1, 1.0, %v914_v48  ;;  %v746_v55 = vsel %vm343_vm2, 1.0, %v914_v48  ;;  %v747_v56 = vsel %vm344_vm3, 1.0, %v914_v48 }
  0x93   : > { %vm308_vm0 = vcmask 523264  }
  0x94   : > { %309 = vst.msk [vmem:[#allocation2] sm:$0xff] %vm308_vm0, %v914_v48 }
  0x95   : > { %v353_v46 = vpop.permute.xlu1 %352  ;;  %v331_v47 = vpop.permute.xlu0 %330 }
  0x96   : > { %vm332_vm4 = vcmp.eq.s32.totalorder %v331_v47, %v312_v42  ;;  %vm333_vm5 = vcmp.eq.s32.totalorder %v331_v47, %v313_v45  ;;  %vm354_vm6 = vcmp.eq.s32.totalorder %v353_v46, %v312_v42  ;;  %vm355_vm7 = vcmp.eq.s32.totalorder %v353_v46, %v313_v45 }
  0x97   : > { %v744_v51 = vsel %vm332_vm4, 1.0, %v914_v48  ;;  %v745_v52 = vsel %vm333_vm5, 1.0, %v914_v48  ;;  %v748_v57 = vsel %vm354_vm6, 1.0, %v914_v48  ;;  %v749_v58 = vsel %vm355_vm7, 1.0, %v914_v48 }
  0x98   : > { %v338_v53 = vadd.f32 %v744_v51, %v742_v49  ;;  %v339_v54 = vadd.f32 %v745_v52, %v743_v50 }
  0x9a   : > { %v349_v59 = vadd.f32 %v746_v55, %v338_v53  ;;  %v350_v60 = vadd.f32 %v747_v56, %v339_v54  ;;  %v364_v61 = vpop.permute.xlu1 %363  ;;  %v375_v62 = vpop.permute.xlu0 %374 }
  0x9b   : > { %vm365_vm8 = vcmp.eq.s32.totalorder %v364_v61, %v312_v42  ;;  %vm366_vm9 = vcmp.eq.s32.totalorder %v364_v61, %v313_v45  ;;  %vm376_vm10 = vcmp.eq.s32.totalorder %v375_v62, %v312_v42  ;;  %vm377_vm11 = vcmp.eq.s32.totalorder %v375_v62, %v313_v45  ;;  %v406_v20 = vld [vmem:[#allocation2] sm:$0xff] }
  0x9c   : > { %v360_v63 = vadd.f32 %v748_v57, %v349_v59  ;;  %v361_v0 = vadd.f32 %v749_v58, %v350_v60  ;;  %v750_v1 = vsel %vm365_vm8, 1.0, %v914_v48  ;;  %v751_v2 = vsel %vm366_vm9, 1.0, %v914_v48 }
  0x9d   : > { %v752_v5 = vsel %vm376_vm10, 1.0, %v914_v48  ;;  %v753_v6 = vsel %vm377_vm11, 1.0, %v914_v48 }
  0x9e   : > { %v371_v3 = vadd.f32 %v750_v1, %v360_v63  ;;  %v372_v4 = vadd.f32 %v751_v2, %v361_v0 }
  0x9f   : > { %v386_v7 = vpop.permute.xlu1 %385 }
  0xa0   : > { %vm387_vm12 = vcmp.eq.s32.totalorder %v386_v7, %v312_v42  ;;  %vm388_vm13 = vcmp.eq.s32.totalorder %v386_v7, %v313_v45  ;;  %v382_v8 = vadd.f32 %v752_v5, %v371_v3  ;;  %v383_v9 = vadd.f32 %v753_v6, %v372_v4 }
  0xa1   : > { %v754_v10 = vsel %vm387_vm12, 1.0, %v914_v48  ;;  %v755_v11 = vsel %vm388_vm13, 1.0, %v914_v48 }
  0xa2   : > { %v393_v13 = vadd.f32 %v754_v10, %v382_v8  ;;  %v394_v14 = vadd.f32 %v755_v11, %v383_v9 }
  0xa4   : > { %v397_v12 = vpop.permute.xlu1 %396 }
  0xa5   : > { %vm398_vm14 = vcmp.eq.s32.totalorder %v397_v12, %v312_v42  ;;  %vm399_vm15 = vcmp.eq.s32.totalorder %v397_v12, %v313_v45 }
  0xa6   : > { %v756_v15 = vsel %vm398_vm14, 1.0, %v914_v48  ;;  %v757_v16 = vsel %vm399_vm15, 1.0, %v914_v48 }
  0xa7   : > { %v404_v17 = vadd.f32 %v756_v15, %v393_v13  ;;  %v405_v18 = vadd.f32 %v757_v16, %v394_v14 }
  0xa9   : > { %503 = vmatprep.mubr.f32.mxu0 %v405_v18 }
  0xaa   : > { %504 = vmatmul.mubr.f32.vlgmr.msra.gmra.mxu0 %v404_v17 }
 0x16a   : > { %v796_v19 = vpop.f32.mrf.mxu0 }
 0x16c   : > { %v797_v21 = vpop.f32.mrf.mxu0 }
 0x16d   : > { %v798_v22 = vadd.f32 %v797_v21, %v796_v19 }
 0x16f   : > { %v509_v23 = vadd.f32 %v798_v22, %v406_v20 }
 0x171   : > { %511 = vst.msk [vmem:[#allocation2] sm:$0xff] %vm308_vm0, %v509_v23 }
 0x178   : > { %v515_v24 = vld [vmem:[#allocation2] sm:$0xff] }
 0x179   : > { %v516_v25 = vmul.f32 0.125, %v515_v24 }
 0x17b   : > { %517 = vst.msk [vmem:[#allocation2] sm:$0xff] %vm308_vm0, %v516_v25 }
 0x17c PF: > { %p758_p5 = scmp.ne.s32.totalorder %s896_s15, 1 }
 0x17e   : > { %521 = sbr.rel (%p758_p5) target bundleno = 602 (0x25a), region = 52 }
 0x183   : > { %v538_v26 = vld [vmem:[%s1143_s2 + $0x78] sm:$0xff]  ;;  %v537_v27 = vld [vmem:[%s1143_s2 + $0x70] sm:$0xff]  ;;  %v536_v28 = vld [vmem:[%s1143_s2 + $0x68] sm:$0xff]  ;;  %v915_v30 = vmov 0.0   ;;  %vm551_vm1 = vcmask 523264   ;;  %v541_v44 = vlaneseq }
 0x184   : > { %571 = vmatprep.subr.mxu0 %v538_v26  ;;  %v535_v29 = vld [vmem:[%s1143_s2 + $0x60] sm:$0xff]  ;;  %619 = vmatprep.mubr.f32.mxu0 %v915_v30  ;;  %v534_v31 = vld [vmem:[%s1143_s2 + $0x58] sm:$0xff]  ;;  %v533_v32 = vld [vmem:[%s1143_s2 + $0x50] sm:$0xff] }
 0x185   : > { %572 = vmatpush1.msra.mxu0 %v537_v27  ;;  %v532_v33 = vld [vmem:[%s1143_s2 + $0x48] sm:$0xff]  ;;  %v531_v34 = vld [vmem:[%s1143_s2 + $0x40] sm:$0xff]  ;;  %v530_v35 = vld [vmem:[%s1143_s2 + $0x38] sm:$0xff]  ;;  %v542_v45 = vshrl.u32 %v541_v44, 7 }
 0x186   : > { %573 = vmatprep.subr.mxu0 %v536_v28  ;;  %v529_v36 = vld [vmem:[%s1143_s2 + $0x30] sm:$0xff]  ;;  %v528_v37 = vld [vmem:[%s1143_s2 + $0x28] sm:$0xff]  ;;  %v527_v38 = vld [vmem:[%s1143_s2 + $0x20] sm:$0xff] }
 0x187   : > { %574 = vmatpush1.msra.mxu0 %v535_v29  ;;  %v526_v39 = vld [vmem:[%s1143_s2 + $0x18] sm:$0xff]  ;;  %v525_v40 = vld [vmem:[%s1143_s2 + $0x10] sm:$0xff]  ;;  %v524_v41 = vld [vmem:[%s1143_s2 + $0x8] sm:$0xff]  ;;  %v543_v46 = vsub.s32 0, %v542_v45  ;;  %v547_v48 = vsub.s32 1, %v542_v45 }
 0x188   : > { %575 = vmatprep.subr.mxu0 %v534_v31  ;;  %v523_v42 = vld [vmem:[%s1143_s2] sm:$0xff] }
 0x189   : > { %576 = vmatpush1.msra.mxu0 %v533_v32  ;;  %v522_v43 = vld [vmem:[#allocation2] sm:$0xff] }
 0x18a   : > { %577 = vmatprep.subr.mxu0 %v532_v33  ;;  %v539_v47 = vld [vmem:[%s1144_s3] sm:$0x3] }
 0x18b   : > { %578 = vmatpush1.msra.mxu0 %v531_v34  ;;  %v544_v49 = vrot.slane %v539_v47, %v543_v46  ;;  %v548_v50 = vrot.slane %v539_v47, %v547_v48 }
 0x18c   : > { %579 = vmatprep.subr.mxu0 %v530_v35 }
 0x18d   : > { %580 = vmatpush1.msra.mxu0 %v529_v36 }
 0x18e   : > { %581 = vmatprep.subr.mxu0 %v528_v37 }
 0x18f   : > { %582 = vmatpush1.msra.mxu0 %v527_v38 }
 0x190   : > { %583 = vmatprep.subr.mxu0 %v526_v39 }
 0x191   : > { %584 = vmatpush1.msra.mxu0 %v525_v40 }
 0x192   : > { %585 = vmatprep.subr.mxu0 %v524_v41 }
 0x193   : > { %586 = vmatpush1.msra.mxu0 %v523_v42 }
 0x194   : > { %759 = vmatmul.mubr.msk.f32.vlgmr.msra.gmra.mxu0 %vm551_vm1, %v522_v43 }
 0x254   : > { %v621_v51 = vpop.f32.mrf.mxu0 }
 0x255   : > { %v622_v52 = vadd.f32 %v621_v51, %v544_v49 }
 0x256   : > { %v623_v53 = vpop.f32.mrf.mxu0 }
 0x257   : > { %626 = vst [vmem:[#allocation3] sm:$0xff] %v622_v52  ;;  %v624_v54 = vadd.f32 %v623_v53, %v548_v50 }
 0x259   : > { %627 = vst [vmem:[#allocation3 + $0x8] sm:$0xff] %v624_v54 }
 0x25a PF: > { %p1118_p6 = scmp.eq.s32.totalorder %s733_s18, 1  ;;  %s916_s14 = smov [#allocation3]  }
 0x25b   : > { %s645_s21 = sshll.u32 %s916_s14, 4  ;;  %s646_s21 = int_to_ptr.vmem [resolvable:$true] %s645_s21 }
 0x25c   : > { %s854_s22 = scalar_lea.vmem %s646_s21, 256  ;;  %s860_s23 = scalar_lea.vmem %s646_s21, 512 }
 0x25d   : > { %p855_p7 = scmp.ne.s32.totalorder %s646_s21, %s854_s22  ;;  %p861_p10 = scmp.lt.s32.totalorder %s646_s21, %s646_s21 }
 0x25e   : > { %p862_p11 = scmp.lt.s32.totalorder %s860_s23, %s854_s22 }
 0x25f   : > { %p856_p8 = pnand %p855_p7, %p1118_p6 }
 0x260   : > { %p863_p12 = por %p862_p11, %p861_p10 }
 0x261   : > { %p857_p9 = pneg %p856_p8 }
 0x263   : > { %p864_p13 = pnand %p863_p12, %p857_p9 }
 0x265   : > { %867 = shalt.err (!%p864_p13)
}
 0x266   : > { %800 = dma.vmem_to_hbm [thread:$0]  (%p1118_p6), %s646_s21, 256, %s1145_s4, [#allocation4]  }
 0x267 PF: > { %p808_p0 = scmp.ge.s32.totalorder %s904_s17, 2  ;;  %p809_p1 = scmp.eq.s32.totalorder %s734_s19, 1 }
 0x269   : > { %p804_p2 = pnand %p809_p1, %p808_p0 }
 0x26b   : > { %p805_p3 = pneg %p804_p2 }
 0x26d   : > { %891 = dma.done.wait (%p805_p3), [#allocation4], 256  }
 0x26e   : > { %893 = vsyncadd (%p805_p3), [#allocation4], 4294967040  ;;  %s17_s17 = sadd.s32 1, %s904_s17   ;;  %s1147_s15 = smov %s900_s16 }
 0x26f   : > { %p14_p4 = scmp.ge.s32.totalorder %s17_s17, 4   ;;  %s1148_s16 = smov %s1150_s20 }
 0x271   :  { %16 = sbr.rel (!%p14_p4) target bundleno = 3 (0x3), region = 93 }
 0x276   :  { %663 = vsyncpa [#allocation4], 1 }
 0x277   :  { %665 = vsyncpa [#allocation4 + $0x1], 1 }

</bundles_post_ra>
